<compile_context>
chip_gen: v6e
topology: v6e:2x2x1
jax: 0.10.0
libtpu: 0.0.40
codegen_flags: <defaults>
</compile_context>

<pallas_src>
import jax
import jax.numpy as jnp
from jax import lax
from jax.experimental import pallas as pl
from jax.experimental.pallas import tpu as pltpu


_NT = (((1,), (1,)), ((), ()))   # contract dim 1 of both operands: x @ w.T
# NOTE: verify on v5e that this NT dot_general does not emit a vxpose of the
# [tn, tk] weight tile; if it does, store weights pre-transposed [in_f, out_f].


def _round_up(x, m):
    return ((x + m - 1) // m) * m


def _pad2d(a, rows, cols):
    pr, pc = rows - a.shape[0], cols - a.shape[1]
    if pr or pc:
        a = jnp.pad(a, ((0, pr), (0, pc)))
    return a


def _pick_tile(padded_dim, desired, unit):
    """Largest multiple of `unit` that divides padded_dim and is <= desired."""
    best = unit
    stop = min(desired, padded_dim)
    for t in range(unit, stop + 1, unit):
        if padded_dim % t == 0:
            best = t
    return best


def _estimate_vmem_bytes(variant, tm, tn, tk, x_sz, w_sz, o_sz):
    """Rough per-step VMEM working set (double-buffered inputs/outputs +
    scratch + in-kernel temporaries)."""
    db = 2
    b = db * tm * tk * x_sz                   # x tile
    b += db * tm * tn * o_sz                  # output tile
    b += db * 8 * (tk + 4 * tn)               # small f32 rows (generous)
    if variant == "eval":
        b += db * tn * tk * w_sz              # wmu
        b += 2 * tm * tn * 4                  # acc + epilogue temp
    elif variant == "factored":
        b += db * 2 * tn * tk * w_sz          # wmu + wsig
        b += 2 * tm * tn * 4                  # two f32 accumulators
        b += tm * tk * x_sz + 2 * tm * tn * 4  # x*eps_in temp + epilogue temps
    else:  # reconstruct
        b += db * 2 * tn * tk * w_sz          # wmu + wsig
        b += db * tn * 128 * 4                # (tn,1) eps_out col, lane-padded
        b += tm * tn * 4                      # accumulator
        b += 2 * tn * tk * w_sz + tm * tn * 4  # eps & w temps + epilogue temp
    return b


def _vmem_capacity_bytes():
    cap = 64 << 20  # assume the smallest per-core VMEM (v7x) if query fails
    try:
        info = pltpu.get_tpu_info()
        cap = int(getattr(info, "vmem_capacity_bytes", cap))
    except Exception:
        pass
    return cap


# ---------------------------------------------------------------------------
# Kernels
# ---------------------------------------------------------------------------

def _eval_kernel(x_ref, wmu_ref, bmu_ref, o_ref, acc_ref):
    k = pl.program_id(2)

    @pl.when(k == 0)
    def _():
        acc_ref[...] = jnp.zeros_like(acc_ref)

    x = x_ref[...]
    w = wmu_ref[...]
    if x.dtype != w.dtype:
        x = x.astype(w.dtype)
    acc_ref[...] += lax.dot_general(x, w, _NT,
                                    preferred_element_type=jnp.float32)

    @pl.when(k == pl.num_programs(2) - 1)
    def _():
        o_ref[...] = (acc_ref[...] + bmu_ref[...]).astype(o_ref.dtype)


def _train_factored_kernel(x_ref, wmu_ref, wsig_ref, eps_in_ref, eps_out_ref,
                           bmu_ref, bsig_ref, o_ref, acc_mu, acc_sig):
    """y = x@wmu^T + ((x*eps_in)@wsig^T)*eps_out + (bmu + bsig*eps_out).

    No per-step O(tn*tk) VPU work and no [tn,tk] temporaries: the only extra
    elementwise op is the O(tm*tk) x*eps_in scaling (cheap at small batch)."""
    k = pl.program_id(2)

    @pl.when(k == 0)
    def _():
        acc_mu[...] = jnp.zeros_like(acc_mu)
        acc_sig[...] = jnp.zeros_like(acc_sig)

    wmu = wmu_ref[...]
    wsig = wsig_ref[...]
    x = x_ref[...]
    if x.dtype != wmu.dtype:
        x = x.astype(wmu.dtype)
    xe = x * eps_in_ref[...].astype(x.dtype)               # [tm, tk]
    acc_mu[...] += lax.dot_general(x, wmu, _NT,
                                   preferred_element_type=jnp.float32)
    acc_sig[...] += lax.dot_general(xe, wsig, _NT,
                                    preferred_element_type=jnp.float32)

    @pl.when(k == pl.num_programs(2) - 1)
    def _():
        eps_o = eps_out_ref[...]                            # [1, tn] f32
        b = bmu_ref[...] + bsig_ref[...] * eps_o            # bias_eps == eps_out
        o_ref[...] = (acc_mu[...] + acc_sig[...] * eps_o + b).astype(o_ref.dtype)


def _train_reconstruct_kernel(x_ref, wmu_ref, wsig_ref, eps_out_col_ref,
                              eps_in_ref, eps_out_row_ref, bmu_ref, bsig_ref,
                              o_ref, acc_ref):
    """Rebuild w = wmu + wsig*outer(eps_out, eps_in) per (j,k) tile; a large tm
    amortizes this O(tn*tk) VPU work under the MXU for compute-bound shapes.
    Reconstruction runs in the streamed weight dtype (bf16 on v6e/v7x when
    compute_dtype=bf16; keep f32 on v5e — no bf16 VALU there)."""
    k = pl.program_id(2)

    @pl.when(k == 0)
    def _():
        acc_ref[...] = jnp.zeros_like(acc_ref)

    wmu = wmu_ref[...]
    wsig = wsig_ref[...]
    cd = wmu.dtype
    eps = eps_out_col_ref[...].astype(cd) * eps_in_ref[...].astype(cd)  # [tn,tk]
    w = wmu + wsig * eps
    x = x_ref[...]
    if x.dtype != cd:
        x = x.astype(cd)
    acc_ref[...] += lax.dot_general(x, w, _NT,
                                    preferred_element_type=jnp.float32)

    @pl.when(k == pl.num_programs(2) - 1)
    def _():
        b = bmu_ref[...] + bsig_ref[...] * eps_out_row_ref[...]
        o_ref[...] = (acc_ref[...] + b).astype(o_ref.dtype)


# ---------------------------------------------------------------------------
# Wrapper
# ---------------------------------------------------------------------------

def noisy_linear(x, weight_mu, weight_sigma, eps_in, eps_out,
                 bias_mu, bias_sigma, *,
                 training=True, compute_dtype=None, variant=None,
                 tm=None, tn=None, tk=None):
    """NoisyLinear forward.

    x: [B, in_f]; weight_*: [out_f, in_f]; eps_in: [in_f]; eps_out: [out_f];
    bias_*: [out_f].  bias_epsilon == eps_out (factored noise, as in the
    module's reset_noise).  Returns [B, out_f] in x's original dtype.
    """
    B, in_f = x.shape
    out_f = weight_mu.shape[0]
    out_dtype = x.dtype

    # Stream x / weights in compute_dtype (e.g. bf16) so weight HBM bytes halve
    # and no per-step tile casts happen in the kernel.
    # NOTE: in a real training loop keep bf16 copies of the params so this cast
    # does not re-stream the weights on every call.
    if compute_dtype is not None:
        x = x.astype(compute_dtype)
        weight_mu = weight_mu.astype(compute_dtype)
        if training:
            weight_sigma = weight_sigma.astype(compute_dtype)

    x_sz = jnp.dtype(x.dtype).itemsize
    w_sz = jnp.dtype(weight_mu.dtype).itemsize
    o_sz = jnp.dtype(out_dtype).itemsize

    # Pad to (8, 128) granularity only — tiles are chosen as exact divisors so
    # the tile clamp never inflates Np/Kp further.
    Mp = _round_up(B, 8)
    Np = _round_up(out_f, 128)
    Kp = _round_up(in_f, 128)

    if not training:
        variant = "eval"
    elif variant is None:
        # Small batch -> weight-streaming bound -> factored (extra MXU flops
        # are free, no per-step reconstruction).  Large batch -> MXU bound ->
        # reconstruct once per (j,k) tile and amortize over a big tm.
        variant = "factored" if Mp < 512 else "reconstruct"

    des_tm = tm if tm is not None else (512 if variant == "reconstruct" else 256)
    des_tn = tn if tn is not None else 512
    des_tk = tk if tk is not None else (1024 if variant == "reconstruct" else 2048)

    vmem_cap = _vmem_capacity_bytes()          # 64 MiB on v7x, 128 MiB v5e/v6e
    vmem_limit = int(vmem_cap * 0.75)
    budget = int(vmem_limit * 0.9)

    while True:
        tm_ = _pick_tile(Mp, des_tm, 8)
        tn_ = _pick_tile(Np, des_tn, 128)
        tk_ = _pick_tile(Kp, des_tk, 128)
        if _estimate_vmem_bytes(variant, tm_, tn_, tk_, x_sz, w_sz, o_sz) <= budget:
            break
        if des_tk > 128 and des_tk >= des_tn:
            des_tk //= 2
        elif des_tn > 128:
            des_tn //= 2
        elif des_tm > 8:
            des_tm //= 2
        else:
            break

    # Megacore (v7x): make sure at least one "parallel" grid axis has >= 2
    # blocks so both TensorCores get work.
    if Mp // tm_ == 1 and Np // tn_ == 1 and Np >= 256:
        tn_ = _pick_tile(Np, Np // 2, 128)

    grid = (Mp // tm_, Np // tn_, Kp // tk_)

    # TODO(synk): for feature dims that are not multiples of 128, pre-pad the
    # parameters once outside the hot path; this jnp.pad would otherwise
    # re-stream both weight matrices through HBM every call.
    xp = _pad2d(x, Mp, Kp)
    wmu_p = _pad2d(weight_mu, Np, Kp)
    bmu_p = _pad2d(bias_mu.astype(jnp.float32).reshape(1, out_f), 1, Np)

    x_spec = pl.BlockSpec((tm_, tk_), lambda i, j, k: (i, k))
    w_spec = pl.BlockSpec((tn_, tk_), lambda i, j, k: (j, k))
    row_n_spec = pl.BlockSpec((1, tn_), lambda i, j, k: (0, j))
    row_k_spec = pl.BlockSpec((1, tk_), lambda i, j, k: (0, k))
    col_n_spec = pl.BlockSpec((tn_, 1), lambda i, j, k: (j, 0))
    out_spec = pl.BlockSpec((tm_, tn_), lambda i, j, k: (i, j))

    if variant == "eval":
        kernel = _eval_kernel
        operands = (xp, wmu_p, bmu_p)
        in_specs = [x_spec, w_spec, row_n_spec]
        scratch = [pltpu.VMEM((tm_, tn_), jnp.float32)]
        flops = 2 * Mp * Np * Kp
    else:
        wsig_p = _pad2d(weight_sigma, Np, Kp)
        eps_in_row = _pad2d(eps_in.astype(jnp.float32).reshape(1, in_f), 1, Kp)
        eps_out_row = _pad2d(eps_out.astype(jnp.float32).reshape(1, out_f), 1, Np)
        bsig_p = _pad2d(bias_sigma.astype(jnp.float32).reshape(1, out_f), 1, Np)
        if variant == "factored":
            kernel = _train_factored_kernel
            operands = (xp, wmu_p, wsig_p, eps_in_row, eps_out_row, bmu_p, bsig_p)
            in_specs = [x_spec, w_spec, w_spec, row_k_spec, row_n_spec,
                        row_n_spec, row_n_spec]
            scratch = [pltpu.VMEM((tm_, tn_), jnp.float32),
                       pltpu.VMEM((tm_, tn_), jnp.float32)]
            flops = 4 * Mp * Np * Kp
        else:  # reconstruct
            kernel = _train_reconstruct_kernel
            eps_out_col = _pad2d(eps_out.astype(jnp.float32).reshape(out_f, 1),
                                 Np, 1)
            operands = (xp, wmu_p, wsig_p, eps_out_col, eps_in_row, eps_out_row,
                        bmu_p, bsig_p)
            in_specs = [x_spec, w_spec, w_spec, col_n_spec, row_k_spec,
                        row_n_spec, row_n_spec, row_n_spec]
            scratch = [pltpu.VMEM((tm_, tn_), jnp.float32)]
            flops = 2 * Mp * Np * Kp

    bytes_accessed = (sum(int(a.size) * jnp.dtype(a.dtype).itemsize
                          for a in operands) + Mp * Np * o_sz)
    cost = pl.CostEstimate(flops=flops, transcendentals=0,
                           bytes_accessed=bytes_accessed)

    y = pl.pallas_call(
        kernel,
        out_shape=jax.ShapeDtypeStruct((Mp, Np), out_dtype),
        grid_spec=pltpu.PrefetchScalarGridSpec(
            num_scalar_prefetch=0,
            grid=grid,
            in_specs=in_specs,
            out_specs=out_spec,
            scratch_shapes=scratch),
        compiler_params=pltpu.CompilerParams(
            dimension_semantics=("parallel", "parallel", "arbitrary"),
            vmem_limit_bytes=vmem_limit),
        cost_estimate=cost,
    )(*operands)
    return y[:B, :out_f]


# ---------------------------------------------------------------------------
# Parameter init matching the PyTorch module
# ---------------------------------------------------------------------------

def _scale_noise(key, size):
    # x.sign() * sqrt(|x|), x ~ N(0, 1)  (matches NoisyLinear._scale_noise)
    x = jax.random.normal(key, (size,), dtype=jnp.float32)
    return jnp.sign(x) * jnp.sqrt(jnp.abs(x))


def init_noisy_linear(key, in_features, out_features, sigma_init=0.5):
    """Returns (weight_mu, weight_sigma, eps_in, eps_out, bias_mu, bias_sigma).

    The module's buffers are weight_epsilon = outer(eps_out, eps_in) and
    bias_epsilon = eps_out (factored noise)."""
    k_wmu, k_bmu, k_ein, k_eout = jax.random.split(key, 4)
    mu_range = 1.0 / (in_features ** 0.5)
    weight_mu = jax.random.uniform(
        k_wmu, (out_features, in_features), jnp.float32, -mu_range, mu_range)
    weight_sigma = jnp.full((out_features, in_features),
                            sigma_init / (in_features ** 0.5), jnp.float32)
    bias_mu = jax.random.uniform(
        k_bmu, (out_features,), jnp.float32, -mu_range, mu_range)
    bias_sigma = jnp.full((out_features,),
                          sigma_init / (out_features ** 0.5), jnp.float32)
    eps_in = _scale_noise(k_ein, in_features)
    eps_out = _scale_noise(k_eout, out_features)
    return weight_mu, weight_sigma, eps_in, eps_out, bias_mu, bias_sigma


if __name__ == "__main__":
    key = jax.random.PRNGKey(0)
    k_params, k_x = jax.random.split(key)

    batch, in_features, out_features = 8, 32, 16
    wmu, wsig, eps_in, eps_out, bmu, bsig = init_noisy_linear(
        k_params, in_features, out_features, sigma_init=0.5)
    x = jax.random.normal(k_x, (batch, in_features), dtype=jnp.float32)

    # Pure-JAX reference (reconstruct the module's epsilon buffers).
    weight_epsilon = jnp.outer(eps_out, eps_in)
    bias_epsilon = eps_out                               # factored noise
    w_ref = wmu + wsig * weight_epsilon
    b_ref = bmu + bsig * bias_epsilon
    y_ref = x @ w_ref.T + b_ref

    # Training forward — memory-bound "factored" path (default at small B).
    y_fac = jax.block_until_ready(
        noisy_linear(x, wmu, wsig, eps_in, eps_out, bmu, bsig, training=True))
    assert jnp.allclose(y_fac, y_ref, atol=1e-5, rtol=1e-5), "factored mismatch"

    # Training forward — compute-bound "reconstruct" path (forced to exercise it).
    y_rec = jax.block_until_ready(
        noisy_linear(x, wmu, wsig, eps_in, eps_out, bmu, bsig, training=True,
                     variant="reconstruct"))
    assert jnp.allclose(y_rec, y_ref, atol=1e-5, rtol=1e-5), "reconstruct mismatch"

    # Eval forward — sigma / epsilon are never streamed.
    y_eval = jax.block_until_ready(
        noisy_linear(x, wmu, wsig, eps_in, eps_out, bmu, bsig, training=False))
    assert jnp.allclose(y_eval, x @ wmu.T + bmu, atol=1e-5, rtol=1e-5), \
        "eval mismatch"

    # bf16 weight-streaming path (halved HBM bytes; f32 accumulation).
    y_bf = jax.block_until_ready(
        noisy_linear(x, wmu, wsig, eps_in, eps_out, bmu, bsig, training=True,
                     compute_dtype=jnp.bfloat16))
    assert jnp.allclose(y_bf, y_ref, atol=5e-2, rtol=5e-2), "bf16 mismatch"

    print("KERNEL_OK")
</pallas_src>

<mosaic_0001>
module attributes {stable_mosaic.version = 11 : i64} {
  func.func @_train_factored_kernel(%arg0: i32, %arg1: i32, %arg2: i32, %arg3: memref<8x128xf32, #tpu.memory_space<vmem>>, %arg4: memref<128x128xf32, #tpu.memory_space<vmem>>, %arg5: memref<128x128xf32, #tpu.memory_space<vmem>>, %arg6: memref<1x128xf32, #tpu.memory_space<vmem>>, %arg7: memref<1x128xf32, #tpu.memory_space<vmem>>, %arg8: memref<1x128xf32, #tpu.memory_space<vmem>>, %arg9: memref<1x128xf32, #tpu.memory_space<vmem>>, %arg10: memref<8x128xf32, #tpu.memory_space<vmem>>, %arg11: memref<8x128xf32, #tpu.memory_space<vmem>>, %arg12: memref<8x128xf32, #tpu.memory_space<vmem>>) attributes {dimension_semantics = [#tpu.dimension_semantics<parallel>, #tpu.dimension_semantics<parallel>, #tpu.dimension_semantics<arbitrary>], iteration_bounds = array<i64: 1, 1, 1>, scalar_prefetch = 0 : i64, scratch_operands = 2 : i64, tpu.core_type = #tpu.core_type<tc>, window_params = [{transform_indices = @transform_0, window_bounds = array<i64: 8, 128>}, {transform_indices = @transform_1, window_bounds = array<i64: 128, 128>}, {transform_indices = @transform_2, window_bounds = array<i64: 128, 128>}, {transform_indices = @transform_3, window_bounds = array<i64: 1, 128>}, {transform_indices = @transform_4, window_bounds = array<i64: 1, 128>}, {transform_indices = @transform_5, window_bounds = array<i64: 1, 128>}, {transform_indices = @transform_6, window_bounds = array<i64: 1, 128>}, {transform_indices = @transform_7, window_bounds = array<i64: 8, 128>}]} {
    %c0_i32 = arith.constant 0 : i32
    %0 = arith.cmpi eq, %arg2, %c0_i32 : i32
    %1 = arith.extui %0 : i1 to i32
    %c0_i32_0 = arith.constant 0 : i32
    %2 = arith.cmpi ne, %1, %c0_i32_0 : i32
    scf.if %2 {
      %cst_19 = arith.constant 0.000000e+00 : f32
      %20 = vector.broadcast %cst_19 : f32 to vector<8x128xf32>
      %c0_20 = arith.constant 0 : index
      %c0_21 = arith.constant 0 : index
      %21 = vector.load %arg11[%c0_20, %c0_21] : memref<8x128xf32, #tpu.memory_space<vmem>>, vector<8x128xf32>
      tpu.vector_store %arg11[%c0_20, %c0_21], %20 {strides = array<i32>} : memref<8x128xf32, #tpu.memory_space<vmem>>, vector<8x128xf32>,
      %cst_22 = arith.constant 0.000000e+00 : f32
      %22 = vector.broadcast %cst_22 : f32 to vector<8x128xf32>
      %c0_23 = arith.constant 0 : index
      %c0_24 = arith.constant 0 : index
      %23 = vector.load %arg12[%c0_23, %c0_24] : memref<8x128xf32, #tpu.memory_space<vmem>>, vector<8x128xf32>
      tpu.vector_store %arg12[%c0_23, %c0_24], %22 {strides = array<i32>} : memref<8x128xf32, #tpu.memory_space<vmem>>, vector<8x128xf32>,
    } else {
    }
    %c0 = arith.constant 0 : index
    %c0_1 = arith.constant 0 : index
    %3 = vector.load %arg4[%c0, %c0_1] : memref<128x128xf32, #tpu.memory_space<vmem>>, vector<128x128xf32>
    %c0_2 = arith.constant 0 : index
    %c0_3 = arith.constant 0 : index
    %4 = vector.load %arg5[%c0_2, %c0_3] : memref<128x128xf32, #tpu.memory_space<vmem>>, vector<128x128xf32>
    %c0_4 = arith.constant 0 : index
    %c0_5 = arith.constant 0 : index
    %5 = vector.load %arg3[%c0_4, %c0_5] : memref<8x128xf32, #tpu.memory_space<vmem>>, vector<8x128xf32>
    %c0_6 = arith.constant 0 : index
    %c0_7 = arith.constant 0 : index
    %6 = vector.load %arg6[%c0_6, %c0_7] : memref<1x128xf32, #tpu.memory_space<vmem>>, vector<1x128xf32>
    %7 = vector.broadcast %6 : vector<1x128xf32> to vector<8x128xf32>
    %8 = arith.mulf %5, %7 : vector<8x128xf32>
    %c0_8 = arith.constant 0 : index
    %c0_9 = arith.constant 0 : index
    %9 = vector.load %arg11[%c0_8, %c0_9] : memref<8x128xf32, #tpu.memory_space<vmem>>, vector<8x128xf32>
    %cst = arith.constant dense<0.000000e+00> : vector<8x128xf32>
    %10 = tpu.matmul %5, %3, %cst {dimension_numbers = #tpu.dot_dimension_numbers<[1], [1], [0], [0], [0, 0, 1, 0], [], []>} : vector<8x128xf32>, vector<128x128xf32>, vector<8x128xf32> -> vector<8x128xf32>
    %11 = arith.addf %9, %10 : vector<8x128xf32>
    %c0_10 = arith.constant 0 : index
    %c0_11 = arith.constant 0 : index
    %12 = vector.load %arg11[%c0_10, %c0_11] : memref<8x128xf32, #tpu.memory_space<vmem>>, vector<8x128xf32>
    tpu.vector_store %arg11[%c0_10, %c0_11], %11 {strides = array<i32>} : memref<8x128xf32, #tpu.memory_space<vmem>>, vector<8x128xf32>,
    %c0_12 = arith.constant 0 : index
    %c0_13 = arith.constant 0 : index
    %13 = vector.load %arg12[%c0_12, %c0_13] : memref<8x128xf32, #tpu.memory_space<vmem>>, vector<8x128xf32>
    %cst_14 = arith.constant dense<0.000000e+00> : vector<8x128xf32>
    %14 = tpu.matmul %8, %4, %cst_14 {dimension_numbers = #tpu.dot_dimension_numbers<[1], [1], [0], [0], [0, 0, 1, 0], [], []>} : vector<8x128xf32>, vector<128x128xf32>, vector<8x128xf32> -> vector<8x128xf32>
    %15 = arith.addf %13, %14 : vector<8x128xf32>
    %c0_15 = arith.constant 0 : index
    %c0_16 = arith.constant 0 : index
    %16 = vector.load %arg12[%c0_15, %c0_16] : memref<8x128xf32, #tpu.memory_space<vmem>>, vector<8x128xf32>
    tpu.vector_store %arg12[%c0_15, %c0_16], %15 {strides = array<i32>} : memref<8x128xf32, #tpu.memory_space<vmem>>, vector<8x128xf32>,
    %c0_i32_17 = arith.constant 0 : i32
    %17 = arith.cmpi eq, %arg2, %c0_i32_17 : i32
    %18 = arith.extui %17 : i1 to i32
    %c0_i32_18 = arith.constant 0 : i32
    %19 = arith.cmpi ne, %18, %c0_i32_18 : i32
    scf.if %19 {
      %c0_19 = arith.constant 0 : index
      %c0_20 = arith.constant 0 : index
      %20 = vector.load %arg7[%c0_19, %c0_20] : memref<1x128xf32, #tpu.memory_space<vmem>>, vector<1x128xf32>
      %c0_21 = arith.constant 0 : index
      %c0_22 = arith.constant 0 : index
      %21 = vector.load %arg8[%c0_21, %c0_22] : memref<1x128xf32, #tpu.memory_space<vmem>>, vector<1x128xf32>
      %c0_23 = arith.constant 0 : index
      %c0_24 = arith.constant 0 : index
      %22 = vector.load %arg9[%c0_23, %c0_24] : memref<1x128xf32, #tpu.memory_space<vmem>>, vector<1x128xf32>
      %23 = arith.mulf %22, %20 : vector<1x128xf32>
      %24 = arith.addf %21, %23 : vector<1x128xf32>
      %c0_25 = arith.constant 0 : index
      %c0_26 = arith.constant 0 : index
      %25 = vector.load %arg11[%c0_25, %c0_26] : memref<8x128xf32, #tpu.memory_space<vmem>>, vector<8x128xf32>
      %c0_27 = arith.constant 0 : index
      %c0_28 = arith.constant 0 : index
      %26 = vector.load %arg12[%c0_27, %c0_28] : memref<8x128xf32, #tpu.memory_space<vmem>>, vector<8x128xf32>
      %27 = vector.broadcast %20 : vector<1x128xf32> to vector<8x128xf32>
      %28 = arith.mulf %26, %27 : vector<8x128xf32>
      %29 = arith.addf %25, %28 : vector<8x128xf32>
      %30 = vector.broadcast %24 : vector<1x128xf32> to vector<8x128xf32>
      %31 = arith.addf %29, %30 : vector<8x128xf32>
      %c0_29 = arith.constant 0 : index
      %c0_30 = arith.constant 0 : index
      %32 = vector.load %arg10[%c0_29, %c0_30] : memref<8x128xf32, #tpu.memory_space<vmem>>, vector<8x128xf32>
      tpu.vector_store %arg10[%c0_29, %c0_30], %31 {strides = array<i32>} : memref<8x128xf32, #tpu.memory_space<vmem>>, vector<8x128xf32>,
    } else {
    }
    return
  }
  func.func @transform_0(%arg0: i32, %arg1: i32, %arg2: i32) -> (i32, i32) {
    %c0_i32 = arith.constant 0 : i32
    return %arg0, %arg2 : i32, i32
  }
  func.func @transform_1(%arg0: i32, %arg1: i32, %arg2: i32) -> (i32, i32) {
    %c0_i32 = arith.constant 0 : i32
    return %arg1, %arg2 : i32, i32
  }
  func.func @transform_2(%arg0: i32, %arg1: i32, %arg2: i32) -> (i32, i32) {
    %c0_i32 = arith.constant 0 : i32
    return %arg1, %arg2 : i32, i32
  }
  func.func @transform_3(%arg0: i32, %arg1: i32, %arg2: i32) -> (i32, i32) {
    %c0_i32 = arith.constant 0 : i32
    %c0_i32_0 = arith.constant 0 : i32
    return %c0_i32, %arg2 : i32, i32
  }
  func.func @transform_4(%arg0: i32, %arg1: i32, %arg2: i32) -> (i32, i32) {
    %c0_i32 = arith.constant 0 : i32
    %c0_i32_0 = arith.constant 0 : i32
    return %c0_i32, %arg1 : i32, i32
  }
  func.func @transform_5(%arg0: i32, %arg1: i32, %arg2: i32) -> (i32, i32) {
    %c0_i32 = arith.constant 0 : i32
    %c0_i32_0 = arith.constant 0 : i32
    return %c0_i32, %arg1 : i32, i32
  }
  func.func @transform_6(%arg0: i32, %arg1: i32, %arg2: i32) -> (i32, i32) {
    %c0_i32 = arith.constant 0 : i32
    %c0_i32_0 = arith.constant 0 : i32
    return %c0_i32, %arg1 : i32, i32
  }
  func.func @transform_7(%arg0: i32, %arg1: i32, %arg2: i32) -> (i32, i32) {
    %c0_i32 = arith.constant 0 : i32
    return %arg0, %arg1 : i32, i32
  }
}

</mosaic_0001>

<bundles_post_ra>
// kernel: tpu_custom_call.1
= control target key start
LH: loop header
LB: loop body
LE: loop exit
PB: predicated region body
PF: predicated region fallthrough
CT: control target
= control target key end

     0   :  { %12 = vsyncpa [#allocation5], 0  ;;  %s606_s0 = inlined_call_operand.hbm [shape: f32[8,128], index: 0, kind: input, shape index: {}]   ;;  %s607_s1 = inlined_call_operand.hbm [shape: f32[128,128], index: 1, kind: input, shape index: {}]   ;;  %s608_s2 = inlined_call_operand.hbm [shape: f32[128,128], index: 2, kind: input, shape index: {}]   ;;  %s609_s3 = inlined_call_operand.vmem [shape: f32[1,128], index: 3, kind: input, shape index: {}]   ;;  %s610_s4 = inlined_call_operand.vmem [shape: f32[1,128], index: 4, kind: input, shape index: {}]   ;;  %s611_s5 = inlined_call_operand.vmem [shape: f32[1,128], index: 5, kind: input, shape index: {}]   ;;  %s612_s6 = inlined_call_operand.vmem [shape: f32[1,128], index: 6, kind: input, shape index: {}]   ;;  %s613_s7 = inlined_call_operand.hbm [shape: f32[8,128], index: 7, kind: output, shape index: {}]  }
   0x1   :  { %13 = vsyncpa [#allocation8], 0 }
   0x2   :  { %14 = vsyncpa [#allocation6], 0  ;;  %s500_s24 = smov [#allocation7]  }
   0x3   :  { %s30_s25 = sshll.u32 %s500_s24, 4  ;;  %s31_s25 = int_to_ptr.vmem [resolvable:$true] %s30_s25 }
   0x4   :  { %s422_s26 = scalar_lea.vmem %s31_s25, 2048  ;;  %p427_p1 = scmp.lt.s32.totalorder %s31_s25, %s31_s25 }
   0x5   :  { %p423_p0 = scmp.ne.s32.totalorder %s31_s25, %s422_s26  ;;  %p428_p2 = scmp.lt.s32.totalorder %s422_s26, %s422_s26 }
   0x7   :  { %p429_p3 = por %p428_p2, %p427_p1 }
   0x9   :  { %p430_p4 = pnand %p429_p3, %p423_p0 }
   0xb   :  { %433 = shalt.err (!%p430_p4)
}
   0xc   :  { %s501_s27 = smov 128   ;;  %s502_s28 = smov 8  }
   0xd   :  { %36 = dma.hbm_to_vmem [thread:$0]  %s607_s1, 2048, %s31_s25, [#allocation8], %s501_s27, %s501_s27, %s502_s28  }
   0xe   :  { %s503_s8 = smov [#allocation4]   ;;  %s504_s10 = smov [#allocation9]  }
   0xf   :  { %s21_s9 = sshll.u32 %s503_s8, 4  ;;  %s42_s11 = sshll.u32 %s504_s10, 4  ;;  %s22_s9 = int_to_ptr.vmem [resolvable:$true] %s21_s9  ;;  %s43_s11 = int_to_ptr.vmem [resolvable:$true] %s42_s11 }
  0x10   :  { %s442_s12 = scalar_lea.vmem %s22_s9, 128  ;;  %p447_p6 = scmp.lt.s32.totalorder %s22_s9, %s22_s9 }
  0x11   :  { %p443_p5 = scmp.ne.s32.totalorder %s22_s9, %s442_s12  ;;  %p448_p7 = scmp.lt.s32.totalorder %s442_s12, %s442_s12 }
  0x13   :  { %p449_p8 = por %p448_p7, %p447_p6 }
  0x15   :  { %p450_p9 = pnand %p449_p8, %p443_p5 }
  0x17   :  { %453 = shalt.err (!%p450_p9)
}
  0x18   :  { %24 = dma.hbm_to_vmem [thread:$0]  %s606_s0, 128, %s22_s9, [#allocation5]  }
  0x19   :  { %s462_s15 = scalar_lea.vmem %s43_s11, 2048  ;;  %p467_p11 = scmp.lt.s32.totalorder %s43_s11, %s43_s11 }
  0x1a   :  { %p463_p10 = scmp.ne.s32.totalorder %s43_s11, %s462_s15  ;;  %p468_p12 = scmp.lt.s32.totalorder %s462_s15, %s462_s15 }
  0x1c   :  { %p469_p13 = por %p468_p12, %p467_p11 }
  0x1e   :  { %p470_p0 = pnand %p469_p13, %p463_p10 }
  0x20   :  { %473 = shalt.err (!%p470_p0)
}
  0x21   :  { %48 = dma.hbm_to_vmem [thread:$0]  %s608_s2, 2048, %s43_s11, [#allocation8], %s501_s27, %s501_s27, %s502_s28  }
  0x22   :  { %494 = dma.done.wait [#allocation5], 128  }
  0x23   :  { %495 = vsyncadd [#allocation5], 4294967168 }
  0x24   :  { %496 = dma.done.wait [#allocation8], 4096  }
  0x25   :  { %497 = vsyncadd [#allocation8], 4294963200  ;;  %v505_v0 = vmov 0.0   ;;  %vm506_vm0 = vmmov 0   ;;  %v87_v1 = vld [vmem:[#allocation7 + $0x78] sm:$0xff]  ;;  %v86_v3 = vld [vmem:[#allocation7 + $0x70] sm:$0xff]  ;;  %v270_v36 = vlaneseq }
  0x26   :  { %336 = vmatprep.subr.mxu0 %v505_v0  ;;  %371 = vmatprep.subr.mxu1 %v505_v0  ;;  %v103_v2 = vld [vmem:[#allocation9 + $0x78] sm:$0xff]  ;;  %v102_v4 = vld [vmem:[#allocation9 + $0x70] sm:$0xff]  ;;  %v85_v5 = vld [vmem:[#allocation7 + $0x68] sm:$0xff]  ;;  %s507_s22 = smov [#allocation10]  }
  0x27   :  { %368 = vmatprep.mubr.msk.f32.mxu0 %vm506_vm0, %v505_v0  ;;  %403 = vmatprep.mubr.msk.f32.mxu1 %vm506_vm0, %v505_v0  ;;  %v101_v6 = vld [vmem:[#allocation9 + $0x68] sm:$0xff]  ;;  %v84_v7 = vld [vmem:[#allocation7 + $0x60] sm:$0xff]  ;;  %v83_v9 = vld [vmem:[#allocation7 + $0x58] sm:$0xff]  ;;  %v271_v37 = vshrl.u32 %v270_v36, 7 }
  0x28   :  { %337 = vmatpush3.xpose.msra.mxu0 %v87_v1  ;;  %372 = vmatpush3.xpose.msra.mxu1 %v103_v2  ;;  %v100_v8 = vld [vmem:[#allocation9 + $0x60] sm:$0xff]  ;;  %v99_v10 = vld [vmem:[#allocation9 + $0x58] sm:$0xff]  ;;  %v82_v11 = vld [vmem:[#allocation7 + $0x50] sm:$0xff] }
  0x29   :  { %338 = vmatprep.subr.mxu0 %v505_v0  ;;  %373 = vmatprep.subr.mxu1 %v505_v0  ;;  %v98_v12 = vld [vmem:[#allocation9 + $0x50] sm:$0xff]  ;;  %v81_v13 = vld [vmem:[#allocation7 + $0x48] sm:$0xff]  ;;  %v80_v15 = vld [vmem:[#allocation7 + $0x40] sm:$0xff]  ;;  %v272_v41 = vsub.s32 0, %v271_v37 }
  0x2a   :  { %v97_v14 = vld [vmem:[#allocation9 + $0x48] sm:$0xff]  ;;  %v96_v16 = vld [vmem:[#allocation9 + $0x40] sm:$0xff]  ;;  %v79_v17 = vld [vmem:[#allocation7 + $0x38] sm:$0xff] }
  0x2b   :  { %v95_v18 = vld [vmem:[#allocation9 + $0x38] sm:$0xff]  ;;  %v78_v19 = vld [vmem:[#allocation7 + $0x30] sm:$0xff]  ;;  %v77_v21 = vld [vmem:[#allocation7 + $0x28] sm:$0xff] }
  0x2c   :  { %339 = vmatpush3.xpose.msra.mxu0 %v86_v3  ;;  %374 = vmatpush3.xpose.msra.mxu1 %v102_v4  ;;  %v94_v20 = vld [vmem:[#allocation9 + $0x30] sm:$0xff]  ;;  %v93_v22 = vld [vmem:[#allocation9 + $0x28] sm:$0xff]  ;;  %v76_v23 = vld [vmem:[#allocation7 + $0x20] sm:$0xff] }
  0x2d   :  { %340 = vmatprep.subr.mxu0 %v505_v0  ;;  %375 = vmatprep.subr.mxu1 %v505_v0  ;;  %v92_v24 = vld [vmem:[#allocation9 + $0x20] sm:$0xff]  ;;  %v75_v25 = vld [vmem:[#allocation7 + $0x18] sm:$0xff]  ;;  %v74_v27 = vld [vmem:[#allocation7 + $0x10] sm:$0xff] }
  0x2e   :  { %v91_v26 = vld [vmem:[#allocation9 + $0x18] sm:$0xff]  ;;  %v90_v28 = vld [vmem:[#allocation9 + $0x10] sm:$0xff]  ;;  %v73_v29 = vld [vmem:[#allocation7 + $0x8] sm:$0xff] }
  0x2f   :  { %v89_v30 = vld [vmem:[#allocation9 + $0x8] sm:$0xff]  ;;  %v104_v31 = vld [vmem:[#allocation4] sm:$0xff]  ;;  %v72_v33 = vld [vmem:[#allocation7] sm:$0xff] }
  0x30   :  { %341 = vmatpush3.xpose.msra.mxu0 %v85_v5  ;;  %376 = vmatpush3.xpose.msra.mxu1 %v101_v6  ;;  %v301_v32 = vld [vmem:[%s609_s3] ss:$0 sm:$0xff]  ;;  %v88_v34 = vld [vmem:[#allocation9] sm:$0xff] }
  0x31   :  { %342 = vmatprep.subr.mxu0 %v505_v0  ;;  %377 = vmatprep.subr.mxu1 %v505_v0  ;;  %v112_v35 = vmul.f32 %v301_v32, %v104_v31  ;;  %v262_v38 = vld [vmem:[%s610_s4] sm:$0x1]  ;;  %s291_s4 = sshll.u32 %s507_s22, 4  ;;  %s292_s4 = int_to_ptr.vmem [resolvable:$true] %s291_s4 }
  0x32   :  { %v264_v39 = vld [vmem:[%s612_s6] sm:$0x1]  ;;  %v273_v44 = vrot.slane %v262_v38, %v272_v41  ;;  %s474_s6 = scalar_lea.vmem %s292_s4, 128  ;;  %p479_p2 = scmp.lt.s32.totalorder %s292_s4, %s292_s4 }
  0x33   :  { %v265_v40 = vmul.f32 %v264_v39, %v262_v38  ;;  %v263_v42 = vld [vmem:[%s611_s5] sm:$0x1]  ;;  %p475_p1 = scmp.ne.s32.totalorder %s292_s4, %s474_s6  ;;  %p480_p3 = scmp.lt.s32.totalorder %s474_s6, %s474_s6 }
  0x34   :  { %343 = vmatpush3.xpose.msra.mxu0 %v84_v7  ;;  %378 = vmatpush3.xpose.msra.mxu1 %v100_v8 }
  0x35   :  { %344 = vmatprep.subr.mxu0 %v505_v0  ;;  %379 = vmatprep.subr.mxu1 %v505_v0  ;;  %v266_v43 = vadd.f32 %v265_v40, %v263_v42  ;;  %p481_p4 = por %p480_p3, %p479_p2 }
  0x37   :  { %v281_v48 = vrot.slane %v266_v43, %v272_v41  ;;  %p482_p5 = pnand %p481_p4, %p475_p1 }
  0x38   :  { %345 = vmatpush3.xpose.msra.mxu0 %v83_v9  ;;  %380 = vmatpush3.xpose.msra.mxu1 %v99_v10 }
  0x39   :  { %346 = vmatprep.subr.mxu0 %v505_v0  ;;  %381 = vmatprep.subr.mxu1 %v505_v0 }
  0x3c   :  { %347 = vmatpush3.xpose.msra.mxu0 %v82_v11  ;;  %382 = vmatpush3.xpose.msra.mxu1 %v98_v12 }
  0x3d   :  { %348 = vmatprep.subr.mxu0 %v505_v0  ;;  %383 = vmatprep.subr.mxu1 %v505_v0 }
  0x40   :  { %349 = vmatpush3.xpose.msra.mxu0 %v81_v13  ;;  %384 = vmatpush3.xpose.msra.mxu1 %v97_v14 }
  0x41   :  { %350 = vmatprep.subr.mxu0 %v505_v0  ;;  %385 = vmatprep.subr.mxu1 %v505_v0 }
  0x44   :  { %351 = vmatpush3.xpose.msra.mxu0 %v80_v15  ;;  %386 = vmatpush3.xpose.msra.mxu1 %v96_v16 }
  0x45   :  { %352 = vmatprep.subr.mxu0 %v505_v0  ;;  %387 = vmatprep.subr.mxu1 %v505_v0 }
  0x48   :  { %353 = vmatpush3.xpose.msra.mxu0 %v79_v17  ;;  %388 = vmatpush3.xpose.msra.mxu1 %v95_v18 }
  0x49   :  { %354 = vmatprep.subr.mxu0 %v505_v0  ;;  %389 = vmatprep.subr.mxu1 %v505_v0 }
  0x4c   :  { %355 = vmatpush3.xpose.msra.mxu0 %v78_v19  ;;  %390 = vmatpush3.xpose.msra.mxu1 %v94_v20 }
  0x4d   :  { %356 = vmatprep.subr.mxu0 %v505_v0  ;;  %391 = vmatprep.subr.mxu1 %v505_v0 }
  0x50   :  { %357 = vmatpush3.xpose.msra.mxu0 %v77_v21  ;;  %392 = vmatpush3.xpose.msra.mxu1 %v93_v22 }
  0x51   :  { %358 = vmatprep.subr.mxu0 %v505_v0  ;;  %393 = vmatprep.subr.mxu1 %v505_v0 }
  0x54   :  { %359 = vmatpush3.xpose.msra.mxu0 %v76_v23  ;;  %394 = vmatpush3.xpose.msra.mxu1 %v92_v24 }
  0x55   :  { %360 = vmatprep.subr.mxu0 %v505_v0  ;;  %395 = vmatprep.subr.mxu1 %v505_v0 }
  0x58   :  { %361 = vmatpush3.xpose.msra.mxu0 %v75_v25  ;;  %396 = vmatpush3.xpose.msra.mxu1 %v91_v26 }
  0x59   :  { %362 = vmatprep.subr.mxu0 %v505_v0  ;;  %397 = vmatprep.subr.mxu1 %v505_v0 }
  0x5c   :  { %363 = vmatpush3.xpose.msra.mxu0 %v74_v27  ;;  %398 = vmatpush3.xpose.msra.mxu1 %v90_v28 }
  0x5d   :  { %364 = vmatprep.subr.mxu0 %v505_v0  ;;  %399 = vmatprep.subr.mxu1 %v505_v0 }
  0x60   :  { %365 = vmatpush3.xpose.msra.mxu0 %v73_v29  ;;  %400 = vmatpush3.xpose.msra.mxu1 %v89_v30 }
  0x61   :  { %366 = vmatprep.subr.mxu0 %v505_v0  ;;  %401 = vmatprep.subr.mxu1 %v505_v0 }
  0x64   :  { %367 = vmatpush3.xpose.msra.mxu0 %v72_v33  ;;  %402 = vmatpush3.xpose.msra.mxu1 %v88_v34 }
  0x67   :  { %369 = vmatmul.mubr.f32.vlgmr.msra.gmra.mxu0 %v104_v31  ;;  %404 = vmatmul.mubr.f32.vlgmr.msra.gmra.mxu1 %v112_v35 }
 0x127   :  { %v180_v45 = vpop.f32.mrf.mxu0  ;;  %v253_v46 = vpop.f32.mrf.mxu1 }
 0x128   :  { %v275_v47 = vmul.f32 %v273_v44, %v253_v46 }
 0x129   :  { %v370_v49 = vpop.f32.mrf.mxu0  ;;  %v405_v50 = vpop.f32.mrf.mxu1 }
 0x12a   :  { %v276_v51 = vadd.f32 %v275_v47, %v180_v45 }
 0x12c   :  { %v283_v52 = vadd.f32 %v281_v48, %v276_v51 }
 0x12e   :  { %284 = vst [vmem:[#allocation10] sm:$0xff] %v283_v52 }
 0x12f   :  { %485 = shalt.err (!%p482_p5)
}
 0x130   :  { %294 = dma.vmem_to_hbm [thread:$0]  %s292_s4, 128, %s613_s7, [#allocation6]  }
 0x131   :  { %498 = dma.done.wait [#allocation6], 128  }
 0x132   :  { %499 = vsyncadd [#allocation6], 4294967168 }
 0x133   :  { %298 = vsyncpa [#allocation5], 1 }
 0x134   :  { %299 = vsyncpa [#allocation8], 1 }
 0x135   :  { %300 = vsyncpa [#allocation6], 1 }

</bundles_post_ra>
